<compile_context>
chip_gen: v6e
topology: v6e:2x2x1
jax: 0.10.0
libtpu: 0.0.40
codegen_flags: <defaults>
</compile_context>

<pallas_src>
import jax
import jax.numpy as jnp
from jax.experimental import pallas as pl
from jax.experimental.pallas import tpu as pltpu


_SUBLANE = 8
_MAX_BATCH_TILE = 2048           # ~1-4 MiB blocks hit ~85% of HBM roofline
_SMALL_PROBLEM_BYTES = 1 << 20   # below this, XLA fusion beats pallas_call overhead


def _vmem_budget_bytes():
    """Generation-aware VMEM sizing (v5e/v6e: 128 MiB, v7x: 64 MiB per TC)."""
    try:
        cap = pltpu.get_tpu_info().vmem_capacity_bytes
    except Exception:
        cap = 64 * 1024 * 1024   # conservative default (v7x per-TensorCore)
    tile_budget = int(cap * 0.70)
    vmem_limit = int(cap * 0.85)
    return tile_budget, vmem_limit


def _fusion_kernel(g_ref, l_ref, wv_ref, bv_ref, wo_ref, bo_ref, out_ref):
    # softmax over a singleton axis == 1.0 exactly, so attended == V and
    #   out = (g @ Wv + bv + l) @ Wo + bo
    v = jnp.dot(g_ref[...], wv_ref[...],
                preferred_element_type=jnp.float32) + bv_ref[...]
    h = (v + l_ref[...]).astype(wo_ref.dtype)
    fused = jnp.dot(h, wo_ref[...],
                    preferred_element_type=jnp.float32) + bo_ref[...]
    out_ref[...] = fused.astype(out_ref.dtype)


def _pick_batch_tile(batch, channels, act_bytes, out_bytes, budget):
    """Largest batch tile whose (double-buffered) blocks fit the VMEM budget."""
    # Weights / biases use constant index_maps but are still double-buffered
    # by the default pipeliner; biases kept f32.
    w_bytes = 2 * (2 * channels * channels * act_bytes + 2 * channels * 4)
    row_bytes = 2 * channels * (2 * act_bytes + out_bytes)   # g, l, out, x2 buffers
    avail = budget - w_bytes
    if avail < row_bytes * _SUBLANE:
        return None                      # weights (nearly) exhaust the budget
    tb = min(avail // row_bytes, _MAX_BATCH_TILE)
    if tb >= batch:
        return batch                     # full-extent block: always legal
    return max((tb // _SUBLANE) * _SUBLANE, _SUBLANE)


def _dense_forward(g, l, wv, bv, wo, bo, out_dtype):
    """Plain-XLA path (small problems / weights too large for a single VMEM pass)."""
    v = jnp.dot(g, wv, preferred_element_type=jnp.float32,
                precision=jax.lax.Precision.HIGHEST) + bv
    fused = jnp.dot(v + l, wo, preferred_element_type=jnp.float32,
                    precision=jax.lax.Precision.HIGHEST) + bo
    return fused.astype(out_dtype)


def cross_attention_fusion(global_feat, local_feat, params, *,
                           use_bf16=False, force_pallas=False):
    """Forward pass of CrossAttentionFusion.

    `params` holds wq/bq/wk/bk/wv/bv/wo/bo with weights stored as (in, out).
    wq/bq/wk/bk are accepted for interface fidelity but are dead compute in the
    forward pass: the attention score is (B, 1, 1) and softmax over a singleton
    axis is exactly 1.0, so attended == V.
    """
    B, C = global_feat.shape
    assert local_feat.shape == (B, C)
    wv, bv = params["wv"], params["bv"]
    wo, bo = params["wo"], params["bo"]
    # Shape assertion guarding the singleton-softmax shortcut (see note above).
    assert wv.shape == (C, C) and wo.shape == (C, C)
    out_dtype = global_feat.dtype

    compute_dtype = jnp.bfloat16 if use_bf16 else global_feat.dtype
    g = global_feat.astype(compute_dtype)
    l = local_feat.astype(compute_dtype)
    wv_c = wv.astype(compute_dtype)
    wo_c = wo.astype(compute_dtype)
    bv2 = bv.reshape(1, C).astype(jnp.float32)
    bo2 = bo.reshape(1, C).astype(jnp.float32)

    act_bytes = jnp.dtype(compute_dtype).itemsize
    out_bytes = jnp.dtype(out_dtype).itemsize

    # Small problems: fixed pallas_call / grid-step overhead dominates.
    if not force_pallas and B * C * (2 * act_bytes + out_bytes) < _SMALL_PROBLEM_BYTES:
        return _dense_forward(g, l, wv_c, bv2, wo_c, bo2, out_dtype)

    tile_budget, vmem_limit = _vmem_budget_bytes()
    tb = _pick_batch_tile(B, C, act_bytes, out_bytes, tile_budget)
    if tb is None:
        # TODO(synk): add a (batch, n, k) feature-tiled variant with an f32
        # accumulator scratch for channel counts whose weights overflow VMEM;
        # until then fall back to XLA (which tiles the GEMMs itself) instead of
        # VMEM-OOMing at compile time.
        return _dense_forward(g, l, wv_c, bv2, wo_c, bo2, out_dtype)

    grid = (pl.cdiv(B, tb),)

    # Activations / output stay UNPADDED at (tb, C): the last block dim equals
    # the full array dim, so the (8, 128) rule is satisfied for any C and no
    # HBM-side pad / slice passes are needed.  Weights/biases use constant
    # index_maps and stay VMEM-resident across the whole grid.
    act_spec = pl.BlockSpec((tb, C), lambda i: (i, 0))
    w_spec = pl.BlockSpec((C, C), lambda i: (0, 0))
    b_spec = pl.BlockSpec((1, C), lambda i: (0, 0))

    out = pl.pallas_call(
        _fusion_kernel,
        out_shape=jax.ShapeDtypeStruct((B, C), out_dtype),
        grid=grid,
        in_specs=[act_spec, act_spec, w_spec, b_spec, w_spec, b_spec],
        out_specs=act_spec,
        compiler_params=pltpu.CompilerParams(
            # TODO(synk): on v7x verify the batch axis actually shards across
            # both TensorCores; switch to pltpu.CORE_PARALLEL if one TC idles.
            dimension_semantics=("parallel",),
            vmem_limit_bytes=vmem_limit,
        ),
    )(g, l, wv_c, bv2, wo_c, bo2)
    return out


def _reference(global_feat, local_feat, params):
    """Pure-JAX reference with the FULL original attention path (for validation)."""
    hi = jax.lax.Precision.HIGHEST
    q = jnp.dot(local_feat, params["wq"], precision=hi) + params["bq"]
    k = jnp.dot(global_feat, params["wk"], precision=hi) + params["bk"]
    v = jnp.dot(global_feat, params["wv"], precision=hi) + params["bv"]
    score = jnp.sum(q * k, axis=-1, keepdims=True)[:, None, :]   # (B, 1, 1)
    attn = jax.nn.softmax(score, axis=-1)                        # identically 1.0
    attended = attn[:, 0, :] * v
    return jnp.dot(attended + local_feat, params["wo"], precision=hi) + params["bo"]


def _make_params(keys, c, h, scale):
    return {
        "wq": jax.random.normal(keys[0], (c, h), jnp.float32) * scale,
        "bq": jax.random.normal(keys[1], (h,), jnp.float32) * scale,
        "wk": jax.random.normal(keys[2], (c, h), jnp.float32) * scale,
        "bk": jax.random.normal(keys[3], (h,), jnp.float32) * scale,
        "wv": jax.random.normal(keys[4], (c, c), jnp.float32) * scale,
        "bv": jax.random.normal(keys[5], (c,), jnp.float32) * scale,
        "wo": jax.random.normal(keys[6], (c, c), jnp.float32) * scale,
        "bo": jax.random.normal(keys[7], (c,), jnp.float32) * scale,
    }


if __name__ == "__main__":
    B, C = 8, 32
    H = C // 2   # hidden_dim default = in_channels // 2

    key = jax.random.PRNGKey(0)
    keys = jax.random.split(key, 10)
    params = _make_params(keys, C, H, 0.1)
    global_feat = jax.random.normal(keys[8], (B, C), jnp.float32)
    local_feat = jax.random.normal(keys[9], (B, C), jnp.float32)

    ref = _reference(global_feat, local_feat, params)

    # Pallas path (forced: the tiny test shape would otherwise take the
    # small-problem XLA fallback).  Loose-ish tolerance covers TPU MXU
    # precision-pass differences between XLA and Mosaic f32 matmuls.
    out = cross_attention_fusion(global_feat, local_feat, params, force_pallas=True)
    out = jax.block_until_ready(out)
    assert out.shape == (B, C)
    assert jnp.allclose(out, ref, atol=1e-2, rtol=1e-2), "pallas mismatch vs reference"

    # Small-problem fallback path (plain XLA) must match too.
    out_fb = jax.block_until_ready(cross_attention_fusion(global_feat, local_feat, params))
    assert jnp.allclose(out_fb, ref, atol=1e-2, rtol=1e-2), "fallback mismatch vs reference"

    # Larger batch exercises a multi-step grid with a partial tail block
    # (B2 not a multiple of the batch tile) -- still cheap at these sizes.
    B2, C2 = 2100, 64
    kg, kl = jax.random.split(keys[8])
    params2 = _make_params(keys, C2, C2 // 2, 0.05)
    g2 = jax.random.normal(kg, (B2, C2), jnp.float32)
    l2 = jax.random.normal(kl, (B2, C2), jnp.float32)
    out2 = jax.block_until_ready(
        cross_attention_fusion(g2, l2, params2, force_pallas=True))
    ref2 = _reference(g2, l2, params2)
    assert out2.shape == (B2, C2)
    assert jnp.allclose(out2, ref2, atol=1e-2, rtol=1e-2), "large-batch mismatch"

    print("KERNEL_OK")
</pallas_src>

<mosaic_0001>
module attributes {stable_mosaic.version = 11 : i64} {
  func.func @_fusion_kernel(%arg0: i32, %arg1: memref<8x32xf32, #tpu.memory_space<vmem>>, %arg2: memref<8x32xf32, #tpu.memory_space<vmem>>, %arg3: memref<32x32xf32, #tpu.memory_space<vmem>>, %arg4: memref<1x32xf32, #tpu.memory_space<vmem>>, %arg5: memref<32x32xf32, #tpu.memory_space<vmem>>, %arg6: memref<1x32xf32, #tpu.memory_space<vmem>>, %arg7: memref<8x32xf32, #tpu.memory_space<vmem>>) attributes {dimension_semantics = [#tpu.dimension_semantics<parallel>], iteration_bounds = array<i64: 1>, scalar_prefetch = 0 : i64, scratch_operands = 0 : i64, tpu.core_type = #tpu.core_type<tc>, window_params = [{transform_indices = @transform_0, window_bounds = array<i64: 8, 32>}, {transform_indices = @transform_1, window_bounds = array<i64: 8, 32>}, {pipeline_mode = #tpu.pipeline_mode<synchronous>, transform_indices = @transform_2, window_bounds = array<i64: 32, 32>}, {pipeline_mode = #tpu.pipeline_mode<synchronous>, transform_indices = @transform_3, window_bounds = array<i64: 1, 32>}, {pipeline_mode = #tpu.pipeline_mode<synchronous>, transform_indices = @transform_4, window_bounds = array<i64: 32, 32>}, {pipeline_mode = #tpu.pipeline_mode<synchronous>, transform_indices = @transform_5, window_bounds = array<i64: 1, 32>}, {transform_indices = @transform_6, window_bounds = array<i64: 8, 32>}]} {
    %c0 = arith.constant 0 : index
    %c0_0 = arith.constant 0 : index
    %0 = vector.load %arg1[%c0, %c0_0] : memref<8x32xf32, #tpu.memory_space<vmem>>, vector<8x32xf32>
    %c0_1 = arith.constant 0 : index
    %c0_2 = arith.constant 0 : index
    %1 = vector.load %arg3[%c0_1, %c0_2] : memref<32x32xf32, #tpu.memory_space<vmem>>, vector<32x32xf32>
    %cst = arith.constant dense<0.000000e+00> : vector<8x32xf32>
    %2 = tpu.matmul %0, %1, %cst {dimension_numbers = #tpu.dot_dimension_numbers<[1], [0], [0], [1], [0, 0, 1, 1], [], []>} : vector<8x32xf32>, vector<32x32xf32>, vector<8x32xf32> -> vector<8x32xf32>
    %c0_3 = arith.constant 0 : index
    %c0_4 = arith.constant 0 : index
    %3 = vector.load %arg4[%c0_3, %c0_4] : memref<1x32xf32, #tpu.memory_space<vmem>>, vector<1x32xf32>
    %4 = vector.broadcast %3 : vector<1x32xf32> to vector<8x32xf32>
    %5 = arith.addf %2, %4 : vector<8x32xf32>
    %c0_5 = arith.constant 0 : index
    %c0_6 = arith.constant 0 : index
    %6 = vector.load %arg2[%c0_5, %c0_6] : memref<8x32xf32, #tpu.memory_space<vmem>>, vector<8x32xf32>
    %7 = arith.addf %5, %6 : vector<8x32xf32>
    %c0_7 = arith.constant 0 : index
    %c0_8 = arith.constant 0 : index
    %8 = vector.load %arg5[%c0_7, %c0_8] : memref<32x32xf32, #tpu.memory_space<vmem>>, vector<32x32xf32>
    %cst_9 = arith.constant dense<0.000000e+00> : vector<8x32xf32>
    %9 = tpu.matmul %7, %8, %cst_9 {dimension_numbers = #tpu.dot_dimension_numbers<[1], [0], [0], [1], [0, 0, 1, 1], [], []>} : vector<8x32xf32>, vector<32x32xf32>, vector<8x32xf32> -> vector<8x32xf32>
    %c0_10 = arith.constant 0 : index
    %c0_11 = arith.constant 0 : index
    %10 = vector.load %arg6[%c0_10, %c0_11] : memref<1x32xf32, #tpu.memory_space<vmem>>, vector<1x32xf32>
    %11 = vector.broadcast %10 : vector<1x32xf32> to vector<8x32xf32>
    %12 = arith.addf %9, %11 : vector<8x32xf32>
    %c0_12 = arith.constant 0 : index
    %c0_13 = arith.constant 0 : index
    %13 = vector.load %arg7[%c0_12, %c0_13] : memref<8x32xf32, #tpu.memory_space<vmem>>, vector<8x32xf32>
    tpu.vector_store %arg7[%c0_12, %c0_13], %12 {strides = array<i32>} : memref<8x32xf32, #tpu.memory_space<vmem>>, vector<8x32xf32>,
    return
  }
  func.func @transform_0(%arg0: i32) -> (i32, i32) {
    %c0_i32 = arith.constant 0 : i32
    %c0_i32_0 = arith.constant 0 : i32
    return %arg0, %c0_i32 : i32, i32
  }
  func.func @transform_1(%arg0: i32) -> (i32, i32) {
    %c0_i32 = arith.constant 0 : i32
    %c0_i32_0 = arith.constant 0 : i32
    return %arg0, %c0_i32 : i32, i32
  }
  func.func @transform_2(%arg0: i32) -> (i32, i32) {
    %c0_i32 = arith.constant 0 : i32
    %c0_i32_0 = arith.constant 0 : i32
    %c0_i32_1 = arith.constant 0 : i32
    return %c0_i32, %c0_i32_0 : i32, i32
  }
  func.func @transform_3(%arg0: i32) -> (i32, i32) {
    %c0_i32 = arith.constant 0 : i32
    %c0_i32_0 = arith.constant 0 : i32
    %c0_i32_1 = arith.constant 0 : i32
    return %c0_i32, %c0_i32_0 : i32, i32
  }
  func.func @transform_4(%arg0: i32) -> (i32, i32) {
    %c0_i32 = arith.constant 0 : i32
    %c0_i32_0 = arith.constant 0 : i32
    %c0_i32_1 = arith.constant 0 : i32
    return %c0_i32, %c0_i32_0 : i32, i32
  }
  func.func @transform_5(%arg0: i32) -> (i32, i32) {
    %c0_i32 = arith.constant 0 : i32
    %c0_i32_0 = arith.constant 0 : i32
    %c0_i32_1 = arith.constant 0 : i32
    return %c0_i32, %c0_i32_0 : i32, i32
  }
  func.func @transform_6(%arg0: i32) -> (i32, i32) {
    %c0_i32 = arith.constant 0 : i32
    %c0_i32_0 = arith.constant 0 : i32
    return %arg0, %c0_i32 : i32, i32
  }
}

</mosaic_0001>

<bundles_post_ra>
// kernel: tpu_custom_call.1
= control target key start
LH: loop header
LB: loop body
LE: loop exit
PB: predicated region body
PF: predicated region fallthrough
CT: control target
= control target key end

     0   :  { %11 = vsyncpa [#allocation3], 0  ;;  %s486_s0 = inlined_call_operand.hbm [shape: f32[8,32], index: 0, kind: input, shape index: {}]   ;;  %s487_s1 = inlined_call_operand.hbm [shape: f32[8,32], index: 1, kind: input, shape index: {}]   ;;  %s488_s2 = inlined_call_operand.hbm [shape: f32[32,32], index: 2, kind: input, shape index: {}]   ;;  %s489_s3 = inlined_call_operand.vmem [shape: f32[1,32], index: 3, kind: input, shape index: {}]   ;;  %s490_s4 = inlined_call_operand.hbm [shape: f32[32,32], index: 4, kind: input, shape index: {}]   ;;  %s491_s5 = inlined_call_operand.vmem [shape: f32[1,32], index: 5, kind: input, shape index: {}]   ;;  %s492_s6 = inlined_call_operand.hbm [shape: f32[8,32], index: 6, kind: output, shape index: {}]  }
   0x1   :  { %12 = vsyncpa [#allocation6], 0 }
   0x2   :  { %13 = vsyncpa [#allocation9], 0 }
   0x3   :  { %14 = vsyncpa [#allocation4], 0  ;;  %s418_s21 = smov [#allocation5]   ;;  %s419_s23 = smov [#allocation2]  }
   0x4   :  { %s31_s22 = sshll.u32 %s418_s21, 4  ;;  %s21_s24 = sshll.u32 %s419_s23, 4  ;;  %s32_s22 = int_to_ptr.vmem [resolvable:$true] %s31_s22  ;;  %s22_s24 = int_to_ptr.vmem [resolvable:$true] %s21_s24 }
   0x5   :  { %s318_s25 = scalar_lea.vmem %s32_s22, 128  ;;  %p323_p1 = scmp.lt.s32.totalorder %s32_s22, %s32_s22 }
   0x6   :  { %p319_p0 = scmp.ne.s32.totalorder %s32_s22, %s318_s25  ;;  %p324_p2 = scmp.lt.s32.totalorder %s318_s25, %s318_s25 }
   0x8   :  { %p325_p3 = por %p324_p2, %p323_p1 }
   0xa   :  { %p326_p4 = pnand %p325_p3, %p319_p0 }
   0xc   :  { %329 = shalt.err (!%p326_p4)
}
   0xd   :  { %34 = dma.hbm_to_vmem [thread:$0]  %s487_s1, 128, %s32_s22, [#allocation6]  }
   0xe   :  { %s338_s28 = scalar_lea.vmem %s22_s24, 128  ;;  %p343_p6 = scmp.lt.s32.totalorder %s22_s24, %s22_s24 }
   0xf   :  { %p339_p5 = scmp.ne.s32.totalorder %s22_s24, %s338_s28  ;;  %p344_p7 = scmp.lt.s32.totalorder %s338_s28, %s338_s28 }
  0x11   :  { %p345_p8 = por %p344_p7, %p343_p6 }
  0x13   :  { %p346_p9 = pnand %p345_p8, %p339_p5 }
  0x15   :  { %349 = shalt.err (!%p346_p9)
}
  0x16   :  { %24 = dma.hbm_to_vmem [thread:$0]  %s486_s0, 128, %s22_s24, [#allocation3]  }
  0x17   :  { %s420_s7 = smov [#allocation7]  }
  0x18   :  { %s40_s8 = sshll.u32 %s420_s7, 4  ;;  %s41_s8 = int_to_ptr.vmem [resolvable:$true] %s40_s8 }
  0x19   :  { %s358_s9 = scalar_lea.vmem %s41_s8, 512  ;;  %p363_p11 = scmp.lt.s32.totalorder %s41_s8, %s41_s8 }
  0x1a   :  { %p359_p10 = scmp.ne.s32.totalorder %s41_s8, %s358_s9  ;;  %p364_p12 = scmp.lt.s32.totalorder %s358_s9, %s358_s9 }
  0x1c   :  { %p365_p13 = por %p364_p12, %p363_p11 }
  0x1e   :  { %p366_p0 = pnand %p365_p13, %p359_p10 }
  0x20   :  { %369 = shalt.err (!%p366_p0)
}
  0x21   :  { %s421_s1 = smov 128   ;;  %s422_s10 = smov 8  }
  0x22   :  { %46 = dma.hbm_to_vmem [thread:$0]  %s488_s2, 512, %s41_s8, [#allocation6], %s421_s1, %s421_s1, %s422_s10  }
  0x23   :  { %s423_s13 = smov [#allocation8]  }
  0x24   :  { %s54_s14 = sshll.u32 %s423_s13, 4  ;;  %s55_s14 = int_to_ptr.vmem [resolvable:$true] %s54_s14 }
  0x25   :  { %s378_s0 = scalar_lea.vmem %s55_s14, 512  ;;  %p383_p2 = scmp.lt.s32.totalorder %s55_s14, %s55_s14 }
  0x26   :  { %p379_p1 = scmp.ne.s32.totalorder %s55_s14, %s378_s0  ;;  %p384_p3 = scmp.lt.s32.totalorder %s378_s0, %s378_s0 }
  0x28   :  { %p385_p4 = por %p384_p3, %p383_p2 }
  0x2a   :  { %p386_p5 = pnand %p385_p4, %p379_p1 }
  0x2c   :  { %389 = shalt.err (!%p386_p5)
}
  0x2d   :  { %60 = dma.hbm_to_vmem [thread:$0]  %s490_s4, 512, %s55_s14, [#allocation9], %s421_s1, %s421_s1, %s422_s10  }
  0x2e   :  { %410 = dma.done.wait [#allocation3], 128  }
  0x2f   :  { %411 = vsyncadd [#allocation3], 4294967168 }
  0x30   :  { %412 = dma.done.wait [#allocation6], 640  }
  0x31   :  { %413 = vsyncadd [#allocation6], 4294966656 }
  0x32   :  { %414 = dma.done.wait [#allocation9], 512  }
  0x33   :  { %415 = vsyncadd [#allocation9], 4294966784  ;;  %v424_v0 = vmov 0.0   ;;  %vm425_vm0 = vmmov 0   ;;  %v79_v1 = vld [vmem:[#allocation7 + $0x18] sm:$0xff]  ;;  %v78_v2 = vld [vmem:[#allocation7 + $0x10] sm:$0xff] }
  0x34   :  { %279 = vmatprep.subr.mxu0 %v424_v0  ;;  %287 = vmatprep.mubr.msk.f32.mxu0 %vm425_vm0, %v424_v0  ;;  %v166_v3 = vld [vmem:[#allocation8 + $0x18] sm:$0xff]  ;;  %v77_v4 = vld [vmem:[#allocation7 + $0x8] sm:$0xff]  ;;  %v76_v5 = vld [vmem:[#allocation7] sm:$0xff]  ;;  %vm87_vm1 = vcmask 261120   ;;  %s426_s19 = smov [#allocation10]  }
  0x35   :  { %290 = vmatprep.subr.mxu1 %v424_v0  ;;  %298 = vmatprep.mubr.msk.f32.mxu1 %vm425_vm0, %v424_v0  ;;  %v75_v6 = vld [vmem:[#allocation2] sm:$0xff]  ;;  %v164_v8 = vld [vmem:[#allocation8 + $0x8] sm:$0xff]  ;;  %v163_v9 = vld [vmem:[#allocation8] sm:$0xff]  ;;  %s254_s20 = sshll.u32 %s426_s19, 4  ;;  %s255_s20 = int_to_ptr.vmem [resolvable:$true] %s254_s20 }
  0x36   :  { %280 = vmatpush3.msra.mxu0 %v79_v1  ;;  %291 = vmatpush3.msra.mxu1 %v166_v3  ;;  %v165_v7 = vld [vmem:[#allocation8 + $0x10] sm:$0xff]  ;;  %v161_v12 = vld [vmem:[#allocation5] sm:$0xff]  ;;  %p395_p7 = scmp.lt.s32.totalorder %s255_s20, %s255_s20 }
  0x37   :  { %281 = vmatprep.subr.mxu0 %v424_v0  ;;  %292 = vmatprep.subr.mxu1 %v424_v0  ;;  %v265_v10 = vld [vmem:[%s489_s3] ss:$0 sm:$0xff]  ;;  %s390_s3 = scalar_lea.vmem %s255_s20, 128 }
  0x38   :  { %282 = vmatpush3.msra.mxu0 %v78_v2  ;;  %293 = vmatpush3.msra.mxu1 %v165_v7  ;;  %v267_v16 = vld [vmem:[%s491_s5] ss:$0 sm:$0xff]  ;;  %p391_p6 = scmp.ne.s32.totalorder %s255_s20, %s390_s3  ;;  %p396_p8 = scmp.lt.s32.totalorder %s390_s3, %s390_s3 }
  0x39   :  { %283 = vmatprep.subr.mxu0 %v424_v0  ;;  %294 = vmatprep.subr.mxu1 %v424_v0 }
  0x3a   :  { %284 = vmatpush3.msra.mxu0 %v77_v4  ;;  %295 = vmatpush3.msra.mxu1 %v164_v8  ;;  %p397_p9 = por %p396_p8, %p395_p7 }
  0x3b   :  { %285 = vmatprep.subr.mxu0 %v424_v0  ;;  %296 = vmatprep.subr.mxu1 %v424_v0 }
  0x3c   :  { %286 = vmatpush3.msra.mxu0 %v76_v5  ;;  %297 = vmatpush3.msra.mxu1 %v163_v9  ;;  %p398_p10 = pnand %p397_p9, %p391_p6 }
  0x3d   :  { %288 = vmatmul.mubr.msk.f32.vlgmr.msra.gmra.mxu0 %vm87_vm1, %v75_v6 }
  0xfd   :  { %v157_v11 = vpop.f32.mrf.mxu0 }
  0xfe   :  { %v158_v13 = vadd.f32 %v265_v10, %v157_v11 }
  0xff   :  { %v289_v14 = vpop.f32.mrf.mxu0 }
 0x100   :  { %v162_v15 = vadd.f32 %v161_v12, %v158_v13 }
 0x102   :  { %299 = vmatmul.mubr.msk.f32.vlgmr.msra.gmra.mxu1 %vm87_vm1, %v162_v15 }
 0x1c2   :  { %v243_v17 = vpop.f32.mrf.mxu1 }
 0x1c3   :  { %v244_v18 = vadd.f32 %v267_v16, %v243_v17 }
 0x1c4   :  { %v300_v19 = vpop.f32.mrf.mxu1 }
 0x1c5   :  { %247 = vst.msk [vmem:[#allocation10] sm:$0xff] %vm87_vm1, %v244_v18 }
 0x1c6   :  { %401 = shalt.err (!%p398_p10)
}
 0x1c7   :  { %257 = dma.vmem_to_hbm [thread:$0]  %s255_s20, 128, %s492_s6, [#allocation4]  }
 0x1c8   :  { %416 = dma.done.wait [#allocation4], 128  }
 0x1c9   :  { %417 = vsyncadd [#allocation4], 4294967168 }
 0x1ca   :  { %261 = vsyncpa [#allocation3], 1 }
 0x1cb   :  { %262 = vsyncpa [#allocation6], 1 }
 0x1cc   :  { %263 = vsyncpa [#allocation9], 1 }
 0x1cd   :  { %264 = vsyncpa [#allocation4], 1 }

</bundles_post_ra>
